<compile_context>
chip_gen: v7x
topology: tpu7x:2x2x1
jax: 0.10.0
libtpu: 0.0.40
codegen_flags: <defaults>
</compile_context>

<pallas_src>
import functools

import jax
import jax.numpy as jnp
from jax.experimental import pallas as pl
from jax.experimental.pallas import tpu as pltpu


def _round_up(v, m):
    return ((v + m - 1) // m) * m


def _angle_linear_kernel(x_ref, w_ref, inv_xn_ref, inv_wn_ref, o_ref, acc_ref):
    k = pl.program_id(2)

    @pl.when(k == 0)
    def _():
        acc_ref[...] = jnp.zeros_like(acc_ref)

    # MXU matmul on raw operands, fp32 accumulation in VMEM scratch.
    acc_ref[...] += jnp.dot(x_ref[...], w_ref[...],
                            preferred_element_type=jnp.float32)

    @pl.when(k == pl.num_programs(2) - 1)
    def _():
        # Fold both L2 normalizations into one fp32 post-scale, then clamp.
        scale = inv_xn_ref[...] * inv_wn_ref[...]          # (tm,1)*(1,tn)
        cos = acc_ref[...] * scale
        lo = jnp.float32(-1.0 + 1e-7)
        hi = jnp.float32(1.0 - 1e-7)
        o_ref[...] = jnp.clip(cos, lo, hi).astype(o_ref.dtype)


@functools.partial(jax.jit, static_argnames=("compute_dtype",))
def angle_simple_linear(x, weight, *, compute_dtype=jnp.bfloat16):
    """x: (B, IN), weight: (IN, OUT) -> (cos_theta,), cos_theta: (B, OUT) f32."""
    B, IN = x.shape
    IN_w, OUT = weight.shape
    assert IN == IN_w

    xf = x.astype(jnp.float32)
    wf = weight.astype(jnp.float32)

    # 1 / max(||.||_2, 1e-12): exactly F.normalize's eps handling, expressed
    # as rsqrt(max(sumsq, eps^2)) so the kernel only needs a multiply.
    eps2 = jnp.float32(1e-24)
    inv_xn = jax.lax.rsqrt(jnp.maximum(jnp.sum(xf * xf, axis=1, keepdims=True), eps2))
    inv_wn = jax.lax.rsqrt(jnp.maximum(jnp.sum(wf * wf, axis=0, keepdims=True), eps2))

    # Tile sizes: MXU / 128-lane aligned, sized for v7x's 64 MiB VMEM.
    # bf16 tiles: 2*(tm*tk + tk*tn)*2B + tm*tn*4B (acc) + 2*tm*tn*4B (out) ~ 3 MiB.
    tm = min(256, _round_up(B, 8))
    tk = min(512, _round_up(IN, 128))
    tn = min(512, _round_up(OUT, 128))

    Bp, INp, OUTp = _round_up(B, tm), _round_up(IN, tk), _round_up(OUT, tn)

    # Zero-pad to tile multiples: zeros contribute nothing to the dot product,
    # and padded rows/cols of the output are sliced off below.
    xp = jnp.zeros((Bp, INp), compute_dtype).at[:B, :IN].set(x.astype(compute_dtype))
    wp = jnp.zeros((INp, OUTp), compute_dtype).at[:IN, :OUT].set(weight.astype(compute_dtype))
    inv_xn_p = jnp.zeros((Bp, 1), jnp.float32).at[:B, :].set(inv_xn)
    inv_wn_p = jnp.zeros((1, OUTp), jnp.float32).at[:, :OUT].set(inv_wn)

    grid = (Bp // tm, OUTp // tn, INp // tk)

    out = pl.pallas_call(
        _angle_linear_kernel,
        out_shape=jax.ShapeDtypeStruct((Bp, OUTp), jnp.float32),
        grid=grid,
        in_specs=[
            pl.BlockSpec((tm, tk), lambda i, j, k: (i, k)),   # x tile
            pl.BlockSpec((tk, tn), lambda i, j, k: (k, j)),   # W tile
            pl.BlockSpec((tm, 1), lambda i, j, k: (i, 0)),    # 1/||x_row||
            pl.BlockSpec((1, tn), lambda i, j, k: (0, j)),    # 1/||W_col||
        ],
        out_specs=pl.BlockSpec((tm, tn), lambda i, j, k: (i, j)),
        scratch_shapes=[pltpu.VMEM((tm, tn), jnp.float32)],
        compiler_params=pltpu.CompilerParams(
            dimension_semantics=("parallel", "parallel", "arbitrary"),
            vmem_limit_bytes=32 * 1024 * 1024,
        ),
    )(xp, wp, inv_xn_p, inv_wn_p)

    # PyTorch module returns a 1-tuple.
    return (out[:B, :OUT],)


def init_weight(key, in_features, out_features):
    """Deterministic re-implementation of the PyTorch init:
       uniform_(-1, 1).renorm_(2, 1, 1e-05).mul_(100000.0)"""
    w = jax.random.uniform(key, (in_features, out_features),
                           minval=-1.0, maxval=1.0, dtype=jnp.float32)
    # renorm over dim=1 slices (columns of the (IN, OUT) matrix): clamp each
    # column's L2 norm to maxnorm=1e-5, then scale by 1e5.
    maxnorm = 1e-5
    col_norm = jnp.sqrt(jnp.sum(w * w, axis=0, keepdims=True))
    scale = jnp.where(col_norm > maxnorm, maxnorm / (col_norm + 1e-7), 1.0)
    return w * scale * 100000.0


def _reference(x, weight):
    xn = x / jnp.maximum(jnp.linalg.norm(x, axis=1, keepdims=True), 1e-12)
    wn = weight / jnp.maximum(jnp.linalg.norm(weight, axis=0, keepdims=True), 1e-12)
    return jnp.clip(xn @ wn, -1.0 + 1e-7, 1.0 - 1e-7)


if __name__ == "__main__":
    key = jax.random.PRNGKey(0)

    # ---- small demo shape (single grid step) --------------------------------
    B, IN, OUT = 8, 32, 128
    kx, kw, k2x, k2w = jax.random.split(key, 4)
    x = jax.random.normal(kx, (B, IN), dtype=jnp.float32)
    weight = init_weight(kw, IN, OUT)

    (cos_bf16,) = angle_simple_linear(x, weight)                    # bf16 MXU operands
    jax.block_until_ready(cos_bf16)
    ref = _reference(x, weight)
    assert cos_bf16.shape == ref.shape
    assert jnp.max(jnp.abs(cos_bf16 - ref)) < 2e-2, "bf16 path mismatch vs reference"

    (cos_f32,) = angle_simple_linear(x, weight, compute_dtype=jnp.float32)
    jax.block_until_ready(cos_f32)
    assert jnp.max(jnp.abs(cos_f32 - ref)) < 1e-4, "fp32 path mismatch vs reference"

    # ---- non-aligned shape exercising padding + multi-step reduction --------
    B2, IN2, OUT2 = 16, 640, 200                                    # -> 2 k-tiles, padded
    x2 = jax.random.normal(k2x, (B2, IN2), dtype=jnp.float32)
    w2 = init_weight(k2w, IN2, OUT2)
    (cos2,) = angle_simple_linear(x2, w2)
    jax.block_until_ready(cos2)
    ref2 = _reference(x2, w2)
    assert cos2.shape == ref2.shape
    assert jnp.max(jnp.abs(cos2 - ref2)) < 2e-2, "tiled/padded path mismatch"

    print("KERNEL_OK")
</pallas_src>

<mosaic_0001>
module attributes {stable_mosaic.version = 11 : i64} {
  func.func @_angle_linear_kernel(%arg0: i32, %arg1: i32, %arg2: i32, %arg3: memref<8x128xbf16, #tpu.memory_space<vmem>>, %arg4: memref<128x128xbf16, #tpu.memory_space<vmem>>, %arg5: memref<8x1xf32, #tpu.memory_space<vmem>>, %arg6: memref<1x128xf32, #tpu.memory_space<vmem>>, %arg7: memref<8x128xf32, #tpu.memory_space<vmem>>, %arg8: memref<8x128xf32, #tpu.memory_space<vmem>>) attributes {dimension_semantics = [#tpu.dimension_semantics<parallel>, #tpu.dimension_semantics<parallel>, #tpu.dimension_semantics<arbitrary>], iteration_bounds = array<i64: 1, 1, 1>, scalar_prefetch = 0 : i64, scratch_operands = 1 : i64, tpu.core_type = #tpu.core_type<tc>, window_params = [{transform_indices = @transform_0, window_bounds = array<i64: 8, 128>}, {transform_indices = @transform_1, window_bounds = array<i64: 128, 128>}, {transform_indices = @transform_2, window_bounds = array<i64: 8, 1>}, {transform_indices = @transform_3, window_bounds = array<i64: 1, 128>}, {transform_indices = @transform_4, window_bounds = array<i64: 8, 128>}]} {
    %c0_i32 = arith.constant 0 : i32
    %0 = arith.cmpi eq, %arg2, %c0_i32 : i32
    %1 = arith.extui %0 : i1 to i32
    %c0_i32_0 = arith.constant 0 : i32
    %2 = arith.cmpi ne, %1, %c0_i32_0 : i32
    scf.if %2 {
      %cst_10 = arith.constant 0.000000e+00 : f32
      %12 = vector.broadcast %cst_10 : f32 to vector<8x128xf32>
      %c0_11 = arith.constant 0 : index
      %c0_12 = arith.constant 0 : index
      %13 = vector.load %arg8[%c0_11, %c0_12] : memref<8x128xf32, #tpu.memory_space<vmem>>, vector<8x128xf32>
      tpu.vector_store %arg8[%c0_11, %c0_12], %12 {strides = array<i32>} : memref<8x128xf32, #tpu.memory_space<vmem>>, vector<8x128xf32>,
    } else {
    }
    %c0 = arith.constant 0 : index
    %c0_1 = arith.constant 0 : index
    %3 = vector.load %arg8[%c0, %c0_1] : memref<8x128xf32, #tpu.memory_space<vmem>>, vector<8x128xf32>
    %c0_2 = arith.constant 0 : index
    %c0_3 = arith.constant 0 : index
    %4 = vector.load %arg3[%c0_2, %c0_3] : memref<8x128xbf16, #tpu.memory_space<vmem>>, vector<8x128xbf16>
    %c0_4 = arith.constant 0 : index
    %c0_5 = arith.constant 0 : index
    %5 = vector.load %arg4[%c0_4, %c0_5] : memref<128x128xbf16, #tpu.memory_space<vmem>>, vector<128x128xbf16>
    %cst = arith.constant dense<0.000000e+00> : vector<8x128xf32>
    %6 = tpu.matmul %4, %5, %cst {dimension_numbers = #tpu.dot_dimension_numbers<[1], [0], [0], [1], [0, 0, 1, 1], [], []>} : vector<8x128xbf16>, vector<128x128xbf16>, vector<8x128xf32> -> vector<8x128xf32>
    %7 = arith.addf %3, %6 : vector<8x128xf32>
    %c0_6 = arith.constant 0 : index
    %c0_7 = arith.constant 0 : index
    %8 = vector.load %arg8[%c0_6, %c0_7] : memref<8x128xf32, #tpu.memory_space<vmem>>, vector<8x128xf32>
    tpu.vector_store %arg8[%c0_6, %c0_7], %7 {strides = array<i32>} : memref<8x128xf32, #tpu.memory_space<vmem>>, vector<8x128xf32>,
    %c0_i32_8 = arith.constant 0 : i32
    %9 = arith.cmpi eq, %arg2, %c0_i32_8 : i32
    %10 = arith.extui %9 : i1 to i32
    %c0_i32_9 = arith.constant 0 : i32
    %11 = arith.cmpi ne, %10, %c0_i32_9 : i32
    scf.if %11 {
      %c0_10 = arith.constant 0 : index
      %c0_11 = arith.constant 0 : index
      %12 = vector.load %arg5[%c0_10, %c0_11] : memref<8x1xf32, #tpu.memory_space<vmem>>, vector<8x1xf32>
      %c0_12 = arith.constant 0 : index
      %c0_13 = arith.constant 0 : index
      %13 = vector.load %arg6[%c0_12, %c0_13] : memref<1x128xf32, #tpu.memory_space<vmem>>, vector<1x128xf32>
      %14 = vector.broadcast %12 : vector<8x1xf32> to vector<8x128xf32>
      %15 = vector.broadcast %13 : vector<1x128xf32> to vector<8x128xf32>
      %16 = arith.mulf %14, %15 : vector<8x128xf32>
      %c0_14 = arith.constant 0 : index
      %c0_15 = arith.constant 0 : index
      %17 = vector.load %arg8[%c0_14, %c0_15] : memref<8x128xf32, #tpu.memory_space<vmem>>, vector<8x128xf32>
      %18 = arith.mulf %17, %16 : vector<8x128xf32>
      %cst_16 = arith.constant -0.99999988 : f32
      %cst_17 = arith.constant 0.99999988 : f32
      %19 = vector.broadcast %cst_16 : f32 to vector<8x128xf32>
      %20 = arith.maximumf %19, %18 : vector<8x128xf32>
      %21 = vector.broadcast %cst_17 : f32 to vector<8x128xf32>
      %22 = arith.minimumf %21, %20 : vector<8x128xf32>
      %c0_18 = arith.constant 0 : index
      %c0_19 = arith.constant 0 : index
      %23 = vector.load %arg7[%c0_18, %c0_19] : memref<8x128xf32, #tpu.memory_space<vmem>>, vector<8x128xf32>
      tpu.vector_store %arg7[%c0_18, %c0_19], %22 {strides = array<i32>} : memref<8x128xf32, #tpu.memory_space<vmem>>, vector<8x128xf32>,
    } else {
    }
    return
  }
  func.func @transform_0(%arg0: i32, %arg1: i32, %arg2: i32) -> (i32, i32) {
    %c0_i32 = arith.constant 0 : i32
    return %arg0, %arg2 : i32, i32
  }
  func.func @transform_1(%arg0: i32, %arg1: i32, %arg2: i32) -> (i32, i32) {
    %c0_i32 = arith.constant 0 : i32
    return %arg2, %arg1 : i32, i32
  }
  func.func @transform_2(%arg0: i32, %arg1: i32, %arg2: i32) -> (i32, i32) {
    %c0_i32 = arith.constant 0 : i32
    %c0_i32_0 = arith.constant 0 : i32
    return %arg0, %c0_i32 : i32, i32
  }
  func.func @transform_3(%arg0: i32, %arg1: i32, %arg2: i32) -> (i32, i32) {
    %c0_i32 = arith.constant 0 : i32
    %c0_i32_0 = arith.constant 0 : i32
    return %c0_i32, %arg1 : i32, i32
  }
  func.func @transform_4(%arg0: i32, %arg1: i32, %arg2: i32) -> (i32, i32) {
    %c0_i32 = arith.constant 0 : i32
    return %arg0, %arg1 : i32, i32
  }
}

</mosaic_0001>

<bundles_post_ra>
// kernel: angle_simple_linear.1
= control target key start
LH: loop header
LB: loop body
LE: loop exit
PB: predicated region body
PF: predicated region fallthrough
CT: control target
= control target key end

     0   :  { %v244_v1 = vmov 0.0   ;;  %vm245_vm0 = vmmov 0   ;;  %v246_v3 = vmov 0   ;;  %s318_s0 = inlined_call_operand.vmem [shape: bf16[8,128], index: 0, kind: input, shape index: {}]   ;;  %s319_s1 = inlined_call_operand.vmem [shape: bf16[128,128], index: 1, kind: input, shape index: {}]   ;;  %s320_s2 = inlined_call_operand.vmem [shape: f32[8,1], index: 2, kind: input, shape index: {}]   ;;  %s321_s3 = inlined_call_operand.vmem [shape: f32[1,128], index: 3, kind: input, shape index: {}]   ;;  %s322_s4 = inlined_call_operand.hbm [shape: f32[8,128], index: 4, kind: output, shape index: {}]  }
   0x1   :  { %v212_v0 = vld [vmem:[%s319_s1] sm:$0xff]   ;;  %187 = vmatprep.subr.bf16.mxu0 %v244_v1  ;;  %v213_v2 = vld [vmem:[%s319_s1 + $0x8] sm:$0xff]   ;;  %203 = vmatprep.mubr.msk.bf16.mxu0 %vm245_vm0, %v244_v1  ;;  %v214_v4 = vld [vmem:[%s319_s1 + $0x10] sm:$0xff]  }
   0x2   :  { %188 = vmatpush3.bf16.msra.mxu0 %v212_v0  ;;  %211 = vset.pattern.permute.xlu0 %v246_v3  ;;  %v135_v5 = vld [vmem:[%s320_s2] sm:$0xff] }
   0x3   :  { %189 = vmatprep.subr.bf16.mxu0 %v244_v1  ;;  %139 = vperm.xlu0 %211, %v135_v5  }
   0x6   :  { %190 = vmatpush3.bf16.msra.mxu0 %v213_v2 }
   0x7   :  { %191 = vmatprep.subr.bf16.mxu0 %v244_v1 }
   0x8   :  { %9 = vsyncpa [#allocation4], 0  ;;  %v215_v6 = vld [vmem:[%s319_s1 + $0x18] sm:$0xff]   ;;  %v216_v7 = vld [vmem:[%s319_s1 + $0x20] sm:$0xff]   ;;  %s247_s10 = smov [#allocation3]  }
   0x9   :  { %v217_v8 = vld [vmem:[%s319_s1 + $0x28] sm:$0xff]   ;;  %v218_v9 = vld [vmem:[%s319_s1 + $0x30] sm:$0xff]   ;;  %v219_v10 = vld [vmem:[%s319_s1 + $0x38] sm:$0xff]   ;;  %s160_s11 = sshll.u32 %s247_s10, 4  ;;  %s161_s11 = int_to_ptr.vmem [resolvable:$true] %s160_s11 }
   0xa   :  { %192 = vmatpush3.bf16.msra.mxu0 %v214_v4  ;;  %v25_v11 = vld [vmem:[%s318_s0] sm:$0xf]  ;;  %s220_s1 = scalar_lea.vmem %s161_s11, 128  ;;  %p225_p1 = scmp.lt.s32.totalorder %s161_s11, %s161_s11 }
   0xb   :  { %193 = vmatprep.subr.bf16.mxu0 %v244_v1  ;;  %v176_v12 = vld [vmem:[%s321_s3] ss:$0 sm:$0xff]  ;;  %p221_p0 = scmp.ne.s32.totalorder %s161_s11, %s220_s1  ;;  %p226_p2 = scmp.lt.s32.totalorder %s220_s1, %s220_s1 }
   0xd   :  { %p227_p3 = por %p226_p2, %p225_p1 }
   0xe   :  { %194 = vmatpush3.bf16.msra.mxu0 %v215_v6 }
   0xf   :  { %195 = vmatprep.subr.bf16.mxu0 %v244_v1  ;;  %p228_p4 = pnand %p227_p3, %p221_p0 }
  0x12   :  { %196 = vmatpush3.bf16.msra.mxu0 %v216_v7 }
  0x13   :  { %197 = vmatprep.subr.bf16.mxu0 %v244_v1 }
  0x16   :  { %198 = vmatpush3.bf16.msra.mxu0 %v217_v8 }
  0x17   :  { %199 = vmatprep.subr.bf16.mxu0 %v244_v1 }
  0x1a   :  { %200 = vmatpush3.bf16.msra.mxu0 %v218_v9 }
  0x1b   :  { %201 = vmatprep.subr.bf16.mxu0 %v244_v1 }
  0x1e   :  { %202 = vmatpush3.bf16.msra.mxu0 %v219_v10 }
  0x21   :  { %204 = vmatmul.mubr.bf16.vlgmr.msra.gmra.mrb[0].mxu0 %v25_v11 }
  0x82   :  { %v140_v13 = vpop.permute.xlu0 %139 }
  0x83   :  { %v148_v14 = vmul.f32 %v176_v12, %v140_v13 }
  0xf4   :  { %v124_v15 = vpop.f32.mrb[0].mxu0 }
  0xf5   :  { %v150_v16 = vmul.f32 %v148_v14, %v124_v15  ;;  %v205_v17 = vpop.f32.mrb[1].mxu0 }
  0xf6   :  { %v127_v18 = vpop.f32.mrb[2].mxu0 }
  0xf7   :  { %v177_v19 = vclamps-f32 %v150_v16, 0.9999999  ;;  %v206_v20 = vpop.f32.mrb[3].mxu0 }
  0xf9   :  { %153 = vst [vmem:[#allocation3] sm:$0xff] %v177_v19 }
  0xfa   :  { %231 = shalt.err (!%p228_p4)
}
  0xfb   :  { %s232_s12 = scalar_lea.hbm %s322_s4, 128 }
  0xfc   :  { %p233_p5 = scmp.ne.s32.totalorder %s322_s4, %s232_s12  ;;  %p236_p6 = scmp.lt.u32.totalorder %s232_s12, %s322_s4 }
  0xfe   :  { %p238_p7 = pnand %p236_p6, %p233_p5 }
 0x100   :  { %241 = shalt.err (!%p238_p7)
}
 0x101   :  { %163 = dma.vmem_to_hbm [thread:$0]  %s161_s11, 128, %s322_s4, [#allocation4]  }
 0x102   :  { %242 = dma.done.wait [#allocation4], 128  }
 0x103   :  { %243 = vsyncadd [#allocation4], 4294967168 }
 0x104   :  { %167 = vsyncpa [#allocation4], 1 }

</bundles_post_ra>
